<compile_context>
chip_gen: v7x
topology: tpu7x:2x2x1
jax: 0.10.0
libtpu: 0.0.40
codegen_flags: <defaults>
</compile_context>

<pallas_src>
import functools

import jax
import jax.numpy as jnp
from jax.experimental import pallas as pl
from jax.experimental.pallas import tpu as pltpu


def _matmul_shift_relu_kernel(x_ref, w_ref, shift_ref, o_ref, *, use_relu):
    # x_ref:     (TM, K)     im2col patch tile   (compute dtype)
    # w_ref:     (K, TC)     BN-scale-folded weights (compute dtype)
    # shift_ref: (1, TC)     folded BN shift (f32)
    # o_ref:     (TM, TC)    lane-dense output tile (f32)
    y = jnp.dot(x_ref[...], w_ref[...], preferred_element_type=jnp.float32)
    y = y + shift_ref[...]
    if use_relu:
        y = jnp.maximum(y, 0.0)
    o_ref[...] = y.astype(o_ref.dtype)


def _round_up(a, b):
    return (a + b - 1) // b * b


def basic_conv_forward(x_nchw, weight_oihw, bn_gamma, bn_beta, bn_mean, bn_var,
                       *, padding=1, eps=1e-5, bn=True, relu=True,
                       use_bf16=False):
    """Forward pass of BasicConv (2D, stride=1, no bias)."""
    N, Cin, H, W = x_nchw.shape
    Cout, _, KH, KW = weight_oihw.shape

    # --- BN folding (inference mode): scale goes into the weights ---
    if bn:
        scale = bn_gamma / jnp.sqrt(bn_var + eps)
        shift = bn_beta - bn_mean * scale
    else:
        scale = jnp.ones((Cout,), jnp.float32)
        shift = jnp.zeros((Cout,), jnp.float32)

    # --- layout plumbing (plain JAX, once in HBM): NCHW->NHWC, pad, im2col ---
    x_nhwc = jnp.transpose(x_nchw, (0, 2, 3, 1))
    x_pad = jnp.pad(x_nhwc, ((0, 0), (padding, padding), (padding, padding), (0, 0)))
    Hp, Wp = H + 2 * padding, W + 2 * padding
    Ho, Wo = Hp - KH + 1, Wp - KW + 1

    patches = jnp.concatenate(
        [x_pad[:, kh:kh + Ho, kw:kw + Wo, :]
         for kh in range(KH) for kw in range(KW)],
        axis=-1)                                   # (N, Ho, Wo, KH*KW*Cin)
    K = KH * KW * Cin
    M = N * Ho * Wo
    patches = patches.reshape(M, K)

    # (Cout, Cin, KH, KW) -> (KH*KW*Cin, Cout), K ordering = (kh, kw, cin).
    w = jnp.transpose(weight_oihw * scale[:, None, None, None], (2, 3, 1, 0))
    w = w.reshape(K, Cout)

    # --- lane-dense tiling ---
    TC = 128                                # Cout tile (multiple of 128 lanes)
    Cp = _round_up(Cout, TC)
    TM = min(256, _round_up(M, 8))          # row tile (sublane multiple)
    Mp = _round_up(M, TM)

    compute_dtype = jnp.bfloat16 if use_bf16 else jnp.float32
    patches = jnp.pad(patches, ((0, Mp - M), (0, 0))).astype(compute_dtype)
    w = jnp.pad(w, ((0, 0), (0, Cp - Cout))).astype(compute_dtype)
    shift = jnp.pad(shift.astype(jnp.float32), (0, Cp - Cout)).reshape(1, Cp)

    # Explicit scoped-VMEM budget sized to the double-buffered tile footprint.
    itemsize = jnp.dtype(compute_dtype).itemsize
    tile_bytes = TM * K * itemsize + K * TC * itemsize + TM * TC * 4 + TC * 4
    vmem_limit = int(min(max(32 << 20, 4 * tile_bytes + (8 << 20)), 64 << 20))

    kernel = functools.partial(_matmul_shift_relu_kernel, use_relu=relu)

    out = pl.pallas_call(
        kernel,
        out_shape=jax.ShapeDtypeStruct((Mp, Cp), jnp.float32),
        grid_spec=pltpu.PrefetchScalarGridSpec(
            num_scalar_prefetch=0,
            grid=(Mp // TM, Cp // TC),
            in_specs=[
                pl.BlockSpec((TM, K), lambda i, j: (i, 0)),
                pl.BlockSpec((K, TC), lambda i, j: (0, j)),
                pl.BlockSpec((1, TC), lambda i, j: (0, j)),
            ],
            out_specs=pl.BlockSpec((TM, TC), lambda i, j: (i, j)),
        ),
        compiler_params=pltpu.CompilerParams(
            dimension_semantics=("parallel", "parallel"),
            vmem_limit_bytes=vmem_limit),
    )(patches, w, shift)

    out = out[:M, :Cout].reshape(N, Ho, Wo, Cout)
    return jnp.transpose(out, (0, 3, 1, 2))        # NHWC -> NCHW


def _reference(x, w, gamma, beta, mean, var, *, padding=1, eps=1e-5):
    y = jax.lax.conv_general_dilated(
        x, w, window_strides=(1, 1), padding=[(padding, padding)] * 2,
        dimension_numbers=("NCHW", "OIHW", "NCHW"))
    scale = gamma / jnp.sqrt(var + eps)
    shift = beta - mean * scale
    y = y * scale[None, :, None, None] + shift[None, :, None, None]
    return jnp.maximum(y, 0.0)


if __name__ == "__main__":
    key = jax.random.PRNGKey(0)
    k_x, k_w, k_g, k_b, k_m, k_v = jax.random.split(key, 6)

    N, Cin, H, W = 2, 4, 16, 16
    Cout, KH, KW = 8, 3, 3

    x = jax.random.normal(k_x, (N, Cin, H, W), jnp.float32)
    weight = jax.random.normal(k_w, (Cout, Cin, KH, KW), jnp.float32) * 0.1
    gamma = jax.random.normal(k_g, (Cout,), jnp.float32) * 0.1 + 1.0
    beta = jax.random.normal(k_b, (Cout,), jnp.float32) * 0.1
    mean = jax.random.normal(k_m, (Cout,), jnp.float32) * 0.1
    var = jax.random.uniform(k_v, (Cout,), jnp.float32, 0.5, 1.5)

    ref = _reference(x, weight, gamma, beta, mean, var, padding=1)

    # f32 MXU path (default): matches the PyTorch module tightly.
    out = basic_conv_forward(x, weight, gamma, beta, mean, var,
                             padding=1, bn=True, relu=True)
    out = jax.block_until_ready(out)
    assert out.shape == (N, Cout, H, W), out.shape
    assert jnp.allclose(out, ref, atol=1e-4, rtol=1e-4), "f32 mismatch vs reference"

    # bf16 MXU path (f32 accumulation): faster, looser tolerance.
    out_bf16 = jax.block_until_ready(
        basic_conv_forward(x, weight, gamma, beta, mean, var,
                           padding=1, bn=True, relu=True, use_bf16=True))
    assert jnp.allclose(out_bf16, ref, atol=1e-1, rtol=5e-2), "bf16 mismatch vs reference"

    print("KERNEL_OK")
</pallas_src>

<mosaic_0001>
module attributes {stable_mosaic.version = 11 : i64} {
  func.func @_matmul_shift_relu_kernel(%arg0: i32, %arg1: i32, %arg2: memref<256x36xf32, #tpu.memory_space<vmem>>, %arg3: memref<36x128xf32, #tpu.memory_space<vmem>>, %arg4: memref<1x128xf32, #tpu.memory_space<vmem>>, %arg5: memref<256x128xf32, #tpu.memory_space<vmem>>) attributes {dimension_semantics = [#tpu.dimension_semantics<parallel>, #tpu.dimension_semantics<parallel>], iteration_bounds = array<i64: 2, 1>, scalar_prefetch = 0 : i64, scratch_operands = 0 : i64, tpu.core_type = #tpu.core_type<tc>, window_params = [{transform_indices = @transform_0, window_bounds = array<i64: 256, 36>}, {transform_indices = @transform_1, window_bounds = array<i64: 36, 128>}, {transform_indices = @transform_2, window_bounds = array<i64: 1, 128>}, {transform_indices = @transform_3, window_bounds = array<i64: 256, 128>}]} {
    %c0 = arith.constant 0 : index
    %c0_0 = arith.constant 0 : index
    %0 = vector.load %arg2[%c0, %c0_0] : memref<256x36xf32, #tpu.memory_space<vmem>>, vector<256x36xf32>
    %c0_1 = arith.constant 0 : index
    %c0_2 = arith.constant 0 : index
    %1 = vector.load %arg3[%c0_1, %c0_2] : memref<36x128xf32, #tpu.memory_space<vmem>>, vector<36x128xf32>
    %cst = arith.constant dense<0.000000e+00> : vector<256x128xf32>
    %2 = tpu.matmul %0, %1, %cst {dimension_numbers = #tpu.dot_dimension_numbers<[1], [0], [0], [1], [0, 0, 1, 1], [], []>} : vector<256x36xf32>, vector<36x128xf32>, vector<256x128xf32> -> vector<256x128xf32>
    %c0_3 = arith.constant 0 : index
    %c0_4 = arith.constant 0 : index
    %3 = vector.load %arg4[%c0_3, %c0_4] : memref<1x128xf32, #tpu.memory_space<vmem>>, vector<1x128xf32>
    %4 = vector.broadcast %3 : vector<1x128xf32> to vector<256x128xf32>
    %5 = arith.addf %2, %4 : vector<256x128xf32>
    %cst_5 = arith.constant 0.000000e+00 : f32
    %6 = vector.broadcast %cst_5 : f32 to vector<256x128xf32>
    %7 = arith.maximumf %5, %6 : vector<256x128xf32>
    %c0_6 = arith.constant 0 : index
    %c0_7 = arith.constant 0 : index
    %8 = vector.load %arg5[%c0_6, %c0_7] : memref<256x128xf32, #tpu.memory_space<vmem>>, vector<256x128xf32>
    tpu.vector_store %arg5[%c0_6, %c0_7], %7 {strides = array<i32>} : memref<256x128xf32, #tpu.memory_space<vmem>>, vector<256x128xf32>,
    return
  }
  func.func @transform_0(%arg0: i32, %arg1: i32) -> (i32, i32) {
    %c0_i32 = arith.constant 0 : i32
    %c0_i32_0 = arith.constant 0 : i32
    return %arg0, %c0_i32 : i32, i32
  }
  func.func @transform_1(%arg0: i32, %arg1: i32) -> (i32, i32) {
    %c0_i32 = arith.constant 0 : i32
    %c0_i32_0 = arith.constant 0 : i32
    return %c0_i32, %arg1 : i32, i32
  }
  func.func @transform_2(%arg0: i32, %arg1: i32) -> (i32, i32) {
    %c0_i32 = arith.constant 0 : i32
    %c0_i32_0 = arith.constant 0 : i32
    return %c0_i32, %arg1 : i32, i32
  }
  func.func @transform_3(%arg0: i32, %arg1: i32) -> (i32, i32) {
    %c0_i32 = arith.constant 0 : i32
    return %arg0, %arg1 : i32, i32
  }
}

</mosaic_0001>

<bundles_post_ra>
// kernel: tpu_custom_call.1
= control target key start
LH: loop header
LB: loop body
LE: loop exit
PB: predicated region body
PF: predicated region fallthrough
CT: control target
= control target key end

     0   :  { %8 = vsyncpa [#allocation3], 0  ;;  %s1359_s0 = inlined_call_operand.vmem [shape: f32[512,36], index: 0, kind: input, shape index: {}]   ;;  %s1360_s1 = inlined_call_operand.vmem [shape: f32[36,128], index: 1, kind: input, shape index: {}]   ;;  %s1361_s2 = inlined_call_operand.vmem [shape: f32[1,128], index: 2, kind: input, shape index: {}]   ;;  %s1362_s3 = inlined_call_operand.hbm [shape: f32[512,128], index: 3, kind: output, shape index: {}]  }
   0x1   :  { %10 = vsyncpa [#allocation3 + $0x1], 0  ;;  %s1084_s12 = smov 0   ;;  %s1086_s13 = smov 0  }
   0x2   :  { %s1088_s14 = smov 0   ;;  %s1090_s15 = smov 0  }
   0x3   :  { %s1092_s16 = smov 0   ;;  %s1094_s17 = smov 0  }
   0x4 LB: > { %s765_s18 = sadd.s32 4294967295, %s1059_s17   ;;  %s766_s19 = sadd.s32 4294967294, %s1059_s17   ;;  %s1059_s17 = sphi %s1094_s17, %s16_s17   ;;  %s1055_s16 = sphi %s1092_s16, %s1369_s16   ;;  %s1051_s15 = sphi %s1090_s15, %s1368_s15   ;;  %s1047_s14 = sphi %s1088_s14, %s1367_s14   ;;  %s1043_s13 = sphi %s1086_s13, %s1366_s13   ;;  %s1039_s12 = sphi %s1084_s12, %s1365_s12  }
   0x5   : > { %s28_s20 = sadd.s32 1, %s1055_s16  ;;  %s115_s21 = sadd.s32 1, %s1047_s14 }
   0x6   : > { %p30_p0 = scmp.ge.s32.totalorder %s28_s20, 2  ;;  %p125_p1 = scmp.ne.s32.totalorder %s1047_s14, %s1043_s13 }
   0x7   : > { %p126_p2 = scmp.eq.s32.totalorder %s765_s18, 1  ;;  %p131_p3 = scmp.ne.s32.totalorder %s1043_s13, %s1039_s12 }
   0x8   : > { %s1371_s20 = smov (%p30_p0, %s28_s20), 0  ;;  %p132_p5 = scmp.eq.s32.totalorder %s766_s19, 1 }
   0x9   : > { %p1124_p4 = por %p126_p2, %p125_p1  ;;  %s110_s23 = ssub.s32 %s1055_s16, %s1371_s20 }
   0xa   : > { %p771_p6 = scmp.ge.s32.totalorder %s1059_s17, 1  ;;  %p113_p7 = scmp.eq.s32.totalorder %s110_s23, 0 }
   0xb   : > { %p1131_p8 = por %p132_p5, %p131_p3  ;;  %p172_p9 = scmp.lt.s32.totalorder %s1059_s17, 3 }
   0xc   : > { %s1137_s25 = scalar_select %p113_p7, %s1047_s14, %s115_s21  }
   0xd   : > { %p173_p10 = pnand %p771_p6, %p172_p9 }
   0xe   : > { %v249_v0 = vld [vmem:[%s1360_s1] sm:$0xff] (!%p173_p10)  ;;  %v250_v1 = vld [vmem:[%s1360_s1 + $0x8] sm:$0xff] (!%p173_p10)  ;;  %v251_v2 = vld [vmem:[%s1360_s1 + $0x10] sm:$0xff] (!%p173_p10)  ;;  %s773_s5 = sshll.u32 (!%p173_p10), %s1051_s15, 5  ;;  %vm358_vm0 = vcmask (!%p173_p10), 1043456   ;;  %vm261_vm1 = vcmask (!%p173_p10), 293888  }
   0xf   : > { %176 = sbr.rel (%p173_p10) target bundleno = 288 (0x120), region = 32  ;;  %v910_v3 = vpack.c.bf16 (!%p173_p10), %v250_v1, %v249_v0  ;;  %v252_v4 = vld [vmem:[%s1360_s1 + $0x18] sm:$0xff] (!%p173_p10)  ;;  %p204_p11 = scmp.lt.s32.totalorder (!%p173_p10), %s773_s5, 63  ;;  %v253_v6 = vld [vmem:[%s1360_s1 + $0x20] sm:$0xf] (!%p173_p10) }
  0x10   : > { %v914_v5 = vpack.c.bf16 (!%p173_p10), %v252_v4, %v251_v2  ;;  %s200_s21 = sand.u32 (!%p173_p10), 1, %s1043_s13   ;;  %v1232_v39 = vld [vmem:[%s1361_s2] ss:$0 sm:$0xff] (!%p173_p10)  ;;  %s814_s29 = sshll.u32 (!%p173_p10), %s1051_s15, 12 }
  0x11   : > { %911 = vmatprep.subr.bf16.mxu0 (!%p173_p10), %v910_v3  ;;  %918 = vmatprep.subr.bf16.mxu1 (!%p173_p10), %v910_v3  ;;  %s772_s27 = sshll.u32 (!%p173_p10), %s200_s21, 8  ;;  %s1313_s6 = scalar_lea.sflag (!%p173_p10), [#allocation3], %s200_s21 }
  0x12   : > { %913 = vmatpush3.bf16.msra.mxu0 (!%p173_p10), %v910_v3  ;;  %921 = vmatpush3.bf16.msra.mxu1 (!%p173_p10), %v910_v3  ;;  %s1240_s28 = scalar_lea.vmem (!%p173_p10), [#allocation2], %s772_s27 }
  0x13   : > { %915 = vmatprep.subr.bf16.mxu0 (!%p173_p10), %v914_v5  ;;  %919 = vmatprep.subr.bf16.mxu1 (!%p173_p10), %v914_v5  ;;  %s666_s30 = sshll.u32 (!%p173_p10), %s1240_s28, 4  ;;  %s1305_s30 = int_to_ptr.vmem [resolvable:$true] %s666_s30 }
  0x14   : > { %s981_s7 = scalar_lea.vmem (!%p173_p10), %s1305_s30, 4096 }
  0x15   : > { %p982_p12 = scmp.ne.s32.totalorder (!%p173_p10), %s1305_s30, %s981_s7 }
  0x16   : > { %s1373_s5 = smov (!%p204_p11, %s773_s5), 63  ;;  %917 = vmatpush3.bf16.msra.mxu0 %v914_v5  ;;  %922 = vmatpush3.bf16.msra.mxu1 %v914_v5 }
  0x17   : > { %s774_s8 = sshll.u32 %s1373_s5, 3  ;;  %860 = vmatprep.subr.msk.mxu0 %vm358_vm0, %v253_v6  ;;  %920 = vmatprep.subr.msk.mxu1 %vm358_vm0, %v253_v6  ;;  %s1303_s5 = scalar_lea.hbm %s1362_s3, %s814_s29 }
  0x18   : > { %s1158_s19 = scalar_lea.vmem %s1359_s0, %s774_s8  ;;  %p983_p13 = pnand %p982_p12, %p1124_p4 }
  0x19   : > { %v217_v7 = vld [vmem:[%s1158_s19] sm:$0xff]  ;;  %v218_v9 = vld [vmem:[%s1158_s19 + $0x8] sm:$0xff]  ;;  %v219_v11 = vld [vmem:[%s1158_s19 + $0x10] sm:$0xff]  ;;  %s1061_s8 = smov [#allocation2]  }
  0x1a   : > { %v233_v8 = vld [vmem:[%s1158_s19 + $0x80] sm:$0xff]  ;;  %862 = vmatprep.mubr.msk.f32.mxu0 %vm261_vm1, %v217_v7  ;;  %v234_v10 = vld [vmem:[%s1158_s19 + $0x88] sm:$0xff]  ;;  %v235_v12 = vld [vmem:[%s1158_s19 + $0x90] sm:$0xff]  ;;  %861 = vmatpush3.msk.msra.mxu0 %vm358_vm0, %v253_v6  ;;  %p984_p0 = pneg %p983_p13  ;;  %s985_s9 = sshll.u32 %s1061_s8, 4  ;;  %s986_s9 = int_to_ptr.vmem [resolvable:$false] %s985_s9 }
  0x1b   : > { %886 = vmatprep.mubr.msk.f32.mxu1 %vm261_vm1, %v233_v8  ;;  %923 = vmatpush3.msk.msra.mxu1 %vm358_vm0, %v253_v6  ;;  %v220_v13 = vld [vmem:[%s1158_s19 + $0x18] sm:$0xff]  ;;  %v221_v15 = vld [vmem:[%s1158_s19 + $0x20] sm:$0xff]  ;;  %v222_v17 = vld [vmem:[%s1158_s19 + $0x28] sm:$0xff]  ;;  %s987_s10 = scalar_lea.vmem %s986_s9, 8192  ;;  %p988_p1 = scmp.lt.s32.totalorder %s1305_s30, %s986_s9 }
  0x1c   : > { %863 = vmatmul.mubr.msk.f32.vlgmr.msra.gmra.mrb[0].mxu0 %vm261_vm1, %v218_v9  ;;  %887 = vmatmul.mubr.msk.f32.vlgmr.msra.gmra.mrb[0].mxu1 %vm261_vm1, %v234_v10  ;;  %v236_v14 = vld [vmem:[%s1158_s19 + $0x98] sm:$0xff]  ;;  %v237_v16 = vld [vmem:[%s1158_s19 + $0xa0] sm:$0xff]  ;;  %v238_v18 = vld [vmem:[%s1158_s19 + $0xa8] sm:$0xff]  ;;  %p989_p2 = scmp.lt.s32.totalorder %s987_s10, %s981_s7 }
  0x1d   : > { %865 = vmatprep.mubr.msk.f32.mxu0 %vm261_vm1, %v219_v11  ;;  %889 = vmatprep.mubr.msk.f32.mxu1 %vm261_vm1, %v235_v12  ;;  %v223_v19 = vld [vmem:[%s1158_s19 + $0x30] sm:$0xff]  ;;  %v224_v21 = vld [vmem:[%s1158_s19 + $0x38] sm:$0xff]  ;;  %v225_v23 = vld [vmem:[%s1158_s19 + $0x40] sm:$0xff] }
  0x1e   : > { %v239_v20 = vld [vmem:[%s1158_s19 + $0xb0] sm:$0xff]  ;;  %v240_v22 = vld [vmem:[%s1158_s19 + $0xb8] sm:$0xff]  ;;  %v241_v24 = vld [vmem:[%s1158_s19 + $0xc0] sm:$0xff]  ;;  %p990_p3 = por %p989_p2, %p988_p1 }
  0x1f   : > { %v226_v25 = vld [vmem:[%s1158_s19 + $0x48] sm:$0xff]  ;;  %v227_v27 = vld [vmem:[%s1158_s19 + $0x50] sm:$0xff]  ;;  %v228_v29 = vld [vmem:[%s1158_s19 + $0x58] sm:$0xff] }
  0x20   : > { %866 = vmatmul.mubr.msk.f32.gmra.mrb[2].mxu0 %vm261_vm1, %v220_v13  ;;  %890 = vmatmul.mubr.msk.f32.gmra.mrb[2].mxu1 %vm261_vm1, %v236_v14  ;;  %v242_v26 = vld [vmem:[%s1158_s19 + $0xc8] sm:$0xff]  ;;  %v243_v28 = vld [vmem:[%s1158_s19 + $0xd0] sm:$0xff]  ;;  %v244_v30 = vld [vmem:[%s1158_s19 + $0xd8] sm:$0xff]  ;;  %p991_p5 = pnand %p990_p3, %p984_p0 }
  0x21   : > { %868 = vmatprep.mubr.msk.f32.mxu0 %vm261_vm1, %v221_v15  ;;  %892 = vmatprep.mubr.msk.f32.mxu1 %vm261_vm1, %v237_v16  ;;  %v229_v31 = vld [vmem:[%s1158_s19 + $0x60] sm:$0xff]  ;;  %v230_v33 = vld [vmem:[%s1158_s19 + $0x68] sm:$0xff]  ;;  %v231_v35 = vld [vmem:[%s1158_s19 + $0x70] sm:$0xff] }
  0x22   : > { %v245_v32 = vld [vmem:[%s1158_s19 + $0xe0] sm:$0xff]  ;;  %v246_v34 = vld [vmem:[%s1158_s19 + $0xe8] sm:$0xff]  ;;  %v247_v36 = vld [vmem:[%s1158_s19 + $0xf0] sm:$0xff] }
  0x23   : > { %v232_v37 = vld [vmem:[%s1158_s19 + $0x78] sm:$0xff] }
  0x24   : > { %869 = vmatmul.mubr.msk.f32.gmra.mrb[4].mxu0 %vm261_vm1, %v222_v17  ;;  %893 = vmatmul.mubr.msk.f32.gmra.mrb[4].mxu1 %vm261_vm1, %v238_v18  ;;  %v248_v38 = vld [vmem:[%s1158_s19 + $0xf8] sm:$0xff] }
  0x25   : > { %871 = vmatprep.mubr.msk.f32.mxu0 %vm261_vm1, %v223_v19  ;;  %895 = vmatprep.mubr.msk.f32.mxu1 %vm261_vm1, %v239_v20 }
  0x28   : > { %872 = vmatmul.mubr.msk.f32.gmra.mrb[6].mxu0 %vm261_vm1, %v224_v21  ;;  %896 = vmatmul.mubr.msk.f32.gmra.mrb[6].mxu1 %vm261_vm1, %v240_v22 }
  0x29   : > { %874 = vmatprep.mubr.msk.f32.mxu0 %vm261_vm1, %v225_v23  ;;  %898 = vmatprep.mubr.msk.f32.mxu1 %vm261_vm1, %v241_v24 }
  0x2c   : > { %875 = vmatmul.mubr.msk.f32.gmra.mrb[8].mxu0 %vm261_vm1, %v226_v25  ;;  %899 = vmatmul.mubr.msk.f32.gmra.mrb[8].mxu1 %vm261_vm1, %v242_v26 }
  0x2d   : > { %877 = vmatprep.mubr.msk.f32.mxu0 %vm261_vm1, %v227_v27  ;;  %901 = vmatprep.mubr.msk.f32.mxu1 %vm261_vm1, %v243_v28 }
  0x30   : > { %878 = vmatmul.mubr.msk.f32.gmra.mrb[10].mxu0 %vm261_vm1, %v228_v29  ;;  %902 = vmatmul.mubr.msk.f32.gmra.mrb[10].mxu1 %vm261_vm1, %v244_v30 }
  0x31   : > { %880 = vmatprep.mubr.msk.f32.mxu0 %vm261_vm1, %v229_v31  ;;  %904 = vmatprep.mubr.msk.f32.mxu1 %vm261_vm1, %v245_v32 }
  0x34   : > { %881 = vmatmul.mubr.msk.f32.gmra.mrb[12].mxu0 %vm261_vm1, %v230_v33  ;;  %905 = vmatmul.mubr.msk.f32.gmra.mrb[12].mxu1 %vm261_vm1, %v246_v34 }
  0x35   : > { %883 = vmatprep.mubr.msk.f32.mxu0 %vm261_vm1, %v231_v35  ;;  %907 = vmatprep.mubr.msk.f32.mxu1 %vm261_vm1, %v247_v36 }
  0x38   : > { %884 = vmatmul.mubr.msk.f32.gmra.mrb[14].mxu0 %vm261_vm1, %v232_v37  ;;  %908 = vmatmul.mubr.msk.f32.gmra.mrb[14].mxu1 %vm261_vm1, %v248_v38 }
  0xef   : > { %v864_v40 = vpop.f32.mrb[0].mxu0  ;;  %v888_v41 = vpop.f32.mrb[0].mxu1 }
  0xf0   : > { %v434_v42 = vadd.f32 %v864_v40, %v1232_v39  ;;  %v514_v43 = vadd.f32 %v888_v41, %v1232_v39  ;;  %v428_v44 = vpop.f32.mrb[1].mxu0  ;;  %v508_v45 = vpop.f32.mrb[1].mxu1 }
  0xf1   : > { %v429_v46 = vadd.f32 %v1232_v39, %v428_v44  ;;  %v509_v47 = vadd.f32 %v1232_v39, %v508_v45 }
  0xf2   : > { %v588_v48 = vmax.f32 %v434_v42, 0.0  ;;  %v604_v49 = vmax.f32 %v514_v43, 0.0 }
  0xf3   : > { %v587_v50 = vmax.f32 %v429_v46, 0.0  ;;  %v603_v51 = vmax.f32 %v509_v47, 0.0  ;;  %v867_v52 = vpop.f32.mrb[2].mxu0  ;;  %v891_v53 = vpop.f32.mrb[2].mxu1 }
  0xf4   : > { %620 = vst [vmem:[%s1240_s28 + $0x8] sm:$0xff] %v588_v48  ;;  %636 = vst [vmem:[%s1240_s28 + $0x88] sm:$0xff] %v604_v49  ;;  %v444_v54 = vadd.f32 %v867_v52, %v1232_v39  ;;  %v524_v55 = vadd.f32 %v891_v53, %v1232_v39  ;;  %v438_v56 = vpop.f32.mrb[3].mxu0  ;;  %v518_v57 = vpop.f32.mrb[3].mxu1 }
  0xf5   : > { %619 = vst [vmem:[%s1240_s28] sm:$0xff] %v587_v50  ;;  %635 = vst [vmem:[%s1240_s28 + $0x80] sm:$0xff] %v603_v51  ;;  %v439_v58 = vadd.f32 %v1232_v39, %v438_v56  ;;  %v519_v59 = vadd.f32 %v1232_v39, %v518_v57 }
  0xf6   : > { %v590_v60 = vmax.f32 %v444_v54, 0.0  ;;  %v606_v61 = vmax.f32 %v524_v55, 0.0 }
  0xf7   : > { %v589_v62 = vmax.f32 %v439_v58, 0.0  ;;  %v605_v63 = vmax.f32 %v519_v59, 0.0  ;;  %v870_v0 = vpop.f32.mrb[4].mxu0  ;;  %v894_v1 = vpop.f32.mrb[4].mxu1 }
  0xf8   : > { %622 = vst [vmem:[%s1240_s28 + $0x18] sm:$0xff] %v590_v60  ;;  %638 = vst [vmem:[%s1240_s28 + $0x98] sm:$0xff] %v606_v61  ;;  %v454_v2 = vadd.f32 %v870_v0, %v1232_v39  ;;  %v534_v3 = vadd.f32 %v894_v1, %v1232_v39  ;;  %v448_v4 = vpop.f32.mrb[5].mxu0  ;;  %v528_v5 = vpop.f32.mrb[5].mxu1 }
  0xf9   : > { %621 = vst [vmem:[%s1240_s28 + $0x10] sm:$0xff] %v589_v62  ;;  %637 = vst [vmem:[%s1240_s28 + $0x90] sm:$0xff] %v605_v63  ;;  %v449_v6 = vadd.f32 %v1232_v39, %v448_v4  ;;  %v529_v7 = vadd.f32 %v1232_v39, %v528_v5 }
  0xfa   : > { %v592_v8 = vmax.f32 %v454_v2, 0.0  ;;  %v608_v9 = vmax.f32 %v534_v3, 0.0 }
  0xfb   : > { %v591_v10 = vmax.f32 %v449_v6, 0.0  ;;  %v607_v11 = vmax.f32 %v529_v7, 0.0  ;;  %v873_v12 = vpop.f32.mrb[6].mxu0  ;;  %v897_v13 = vpop.f32.mrb[6].mxu1 }
  0xfc   : > { %624 = vst [vmem:[%s1240_s28 + $0x28] sm:$0xff] %v592_v8  ;;  %640 = vst [vmem:[%s1240_s28 + $0xa8] sm:$0xff] %v608_v9  ;;  %v464_v14 = vadd.f32 %v873_v12, %v1232_v39  ;;  %v544_v15 = vadd.f32 %v897_v13, %v1232_v39  ;;  %v458_v16 = vpop.f32.mrb[7].mxu0  ;;  %v538_v17 = vpop.f32.mrb[7].mxu1 }
  0xfd   : > { %623 = vst [vmem:[%s1240_s28 + $0x20] sm:$0xff] %v591_v10  ;;  %639 = vst [vmem:[%s1240_s28 + $0xa0] sm:$0xff] %v607_v11  ;;  %v459_v18 = vadd.f32 %v1232_v39, %v458_v16  ;;  %v539_v19 = vadd.f32 %v1232_v39, %v538_v17 }
  0xfe   : > { %v594_v20 = vmax.f32 %v464_v14, 0.0  ;;  %v610_v21 = vmax.f32 %v544_v15, 0.0 }
  0xff   : > { %v593_v22 = vmax.f32 %v459_v18, 0.0  ;;  %v609_v23 = vmax.f32 %v539_v19, 0.0  ;;  %v876_v24 = vpop.f32.mrb[8].mxu0  ;;  %v900_v25 = vpop.f32.mrb[8].mxu1 }
 0x100   : > { %626 = vst [vmem:[%s1240_s28 + $0x38] sm:$0xff] %v594_v20  ;;  %642 = vst [vmem:[%s1240_s28 + $0xb8] sm:$0xff] %v610_v21  ;;  %v474_v26 = vadd.f32 %v876_v24, %v1232_v39  ;;  %v554_v27 = vadd.f32 %v900_v25, %v1232_v39  ;;  %v468_v28 = vpop.f32.mrb[9].mxu0  ;;  %v548_v29 = vpop.f32.mrb[9].mxu1 }
 0x101   : > { %625 = vst [vmem:[%s1240_s28 + $0x30] sm:$0xff] %v593_v22  ;;  %641 = vst [vmem:[%s1240_s28 + $0xb0] sm:$0xff] %v609_v23  ;;  %v469_v30 = vadd.f32 %v1232_v39, %v468_v28  ;;  %v549_v31 = vadd.f32 %v1232_v39, %v548_v29 }
 0x102   : > { %v596_v32 = vmax.f32 %v474_v26, 0.0  ;;  %v612_v33 = vmax.f32 %v554_v27, 0.0 }
 0x103   : > { %v595_v34 = vmax.f32 %v469_v30, 0.0  ;;  %v611_v35 = vmax.f32 %v549_v31, 0.0  ;;  %v879_v36 = vpop.f32.mrb[10].mxu0  ;;  %v903_v37 = vpop.f32.mrb[10].mxu1 }
 0x104   : > { %628 = vst [vmem:[%s1240_s28 + $0x48] sm:$0xff] %v596_v32  ;;  %644 = vst [vmem:[%s1240_s28 + $0xc8] sm:$0xff] %v612_v33  ;;  %v484_v38 = vadd.f32 %v879_v36, %v1232_v39  ;;  %v564_v40 = vadd.f32 %v903_v37, %v1232_v39  ;;  %v478_v41 = vpop.f32.mrb[11].mxu0  ;;  %v558_v42 = vpop.f32.mrb[11].mxu1 }
 0x105   : > { %627 = vst [vmem:[%s1240_s28 + $0x40] sm:$0xff] %v595_v34  ;;  %643 = vst [vmem:[%s1240_s28 + $0xc0] sm:$0xff] %v611_v35  ;;  %v479_v43 = vadd.f32 %v1232_v39, %v478_v41  ;;  %v559_v44 = vadd.f32 %v1232_v39, %v558_v42 }
 0x106   : > { %v598_v45 = vmax.f32 %v484_v38, 0.0  ;;  %v614_v46 = vmax.f32 %v564_v40, 0.0 }
 0x107   : > { %v597_v47 = vmax.f32 %v479_v43, 0.0  ;;  %v613_v48 = vmax.f32 %v559_v44, 0.0  ;;  %v882_v49 = vpop.f32.mrb[12].mxu0  ;;  %v906_v50 = vpop.f32.mrb[12].mxu1 }
 0x108   : > { %630 = vst [vmem:[%s1240_s28 + $0x58] sm:$0xff] %v598_v45  ;;  %646 = vst [vmem:[%s1240_s28 + $0xd8] sm:$0xff] %v614_v46  ;;  %v494_v51 = vadd.f32 %v882_v49, %v1232_v39  ;;  %v574_v52 = vadd.f32 %v906_v50, %v1232_v39  ;;  %v488_v53 = vpop.f32.mrb[13].mxu0  ;;  %v568_v54 = vpop.f32.mrb[13].mxu1 }
 0x109   : > { %629 = vst [vmem:[%s1240_s28 + $0x50] sm:$0xff] %v597_v47  ;;  %645 = vst [vmem:[%s1240_s28 + $0xd0] sm:$0xff] %v613_v48  ;;  %v489_v55 = vadd.f32 %v1232_v39, %v488_v53  ;;  %v569_v56 = vadd.f32 %v1232_v39, %v568_v54 }
 0x10a   : > { %v600_v57 = vmax.f32 %v494_v51, 0.0  ;;  %v616_v58 = vmax.f32 %v574_v52, 0.0 }
 0x10b   : > { %v599_v59 = vmax.f32 %v489_v55, 0.0  ;;  %v615_v60 = vmax.f32 %v569_v56, 0.0  ;;  %v885_v61 = vpop.f32.mrb[14].mxu0  ;;  %v909_v62 = vpop.f32.mrb[14].mxu1 }
 0x10c   : > { %632 = vst [vmem:[%s1240_s28 + $0x68] sm:$0xff] %v600_v57  ;;  %648 = vst [vmem:[%s1240_s28 + $0xe8] sm:$0xff] %v616_v58  ;;  %v504_v63 = vadd.f32 %v885_v61, %v1232_v39  ;;  %v584_v0 = vadd.f32 %v909_v62, %v1232_v39  ;;  %v498_v1 = vpop.f32.mrb[15].mxu0  ;;  %v578_v2 = vpop.f32.mrb[15].mxu1 }
 0x10d   : > { %631 = vst [vmem:[%s1240_s28 + $0x60] sm:$0xff] %v599_v59  ;;  %647 = vst [vmem:[%s1240_s28 + $0xe0] sm:$0xff] %v615_v60  ;;  %v499_v3 = vadd.f32 %v1232_v39, %v498_v1  ;;  %v579_v4 = vadd.f32 %v1232_v39, %v578_v2 }
 0x10e   : > { %v602_v5 = vmax.f32 %v504_v63, 0.0  ;;  %v618_v6 = vmax.f32 %v584_v0, 0.0 }
 0x10f   : > { %v601_v7 = vmax.f32 %v499_v3, 0.0  ;;  %v617_v8 = vmax.f32 %v579_v4, 0.0 }
 0x110   : > { %634 = vst [vmem:[%s1240_s28 + $0x78] sm:$0xff] %v602_v5  ;;  %650 = vst [vmem:[%s1240_s28 + $0xf8] sm:$0xff] %v618_v6 }
 0x111   : > { %633 = vst [vmem:[%s1240_s28 + $0x70] sm:$0xff] %v601_v7  ;;  %649 = vst [vmem:[%s1240_s28 + $0xf0] sm:$0xff] %v617_v8 }
 0x112   : > { %994 = shalt.err (!%p991_p5)
}
 0x113   : > { %s995_s11 = scalar_lea.hbm %s1303_s5, 4096  ;;  %s999_s21 = scalar_lea.hbm %s1362_s3, 8192 }
 0x114   : > { %p996_p6 = scmp.ne.s32.totalorder %s1303_s5, %s995_s11  ;;  %p1000_p10 = scmp.lt.u32.totalorder %s1303_s5, %s1362_s3 }
 0x115   : > { %p1001_p11 = scmp.lt.u32.totalorder %s999_s21, %s995_s11  ;;  %p1003_p13 = scmp.lt.u32.totalorder %s995_s11, %s1303_s5 }
 0x116   : > { %p997_p7 = pnand %p996_p6, %p1124_p4 }
 0x117   : > { %p1002_p12 = por %p1001_p11, %p1000_p10 }
 0x118   : > { %p998_p9 = pneg %p997_p7 }
 0x119   : > { %p1004_p0 = por %p1003_p13, %p1002_p12 }
 0x11b   : > { %p1005_p1 = pnand %p1004_p0, %p998_p9 }
 0x11d   : > { %1008 = shalt.err (!%p1005_p1)
}
 0x11e   : > { %s1062_s27 = smov 128   ;;  %s1063_s28 = smov 8  }
 0x11f   : > { %924 = dma.vmem_to_hbm [thread:$0]  (%p1124_p4), %s1305_s30, 4096, %s1303_s5, %s1313_s6, %s1062_s27, %s1062_s27, %s1063_s28  }
 0x120 PF: > { %p930_p2 = scmp.ge.s32.totalorder %s1059_s17, 2  ;;  %s681_s29 = sand.u32 1, %s1039_s12  }
 0x121   : > { %s682_s15 = scalar_lea.sflag [#allocation3], %s681_s29 }
 0x122   : > { %p927_p3 = pnand %p930_p2, %p1131_p8 }
 0x124   : > { %1034 = dma.done.wait (!%p927_p3), %s682_s15, 4096  }
 0x125   : > { %1036 = vsyncadd (!%p927_p3), %s682_s15, 4294963200  ;;  %s16_s17 = sadd.s32 1, %s1059_s17   ;;  %s1365_s12 = smov %s1043_s13 }
 0x126   : > { %p13_p5 = scmp.ge.s32.totalorder %s16_s17, 4   ;;  %s1366_s13 = smov %s1047_s14 }
 0x127   : > { %s1367_s14 = smov %s1137_s25  ;;  %s1368_s15 = smov %s1055_s16 }
 0x128   : > { %s1369_s16 = smov %s1371_s20  ;;  %15 = sbr.rel (!%p13_p5) target bundleno = 4 (0x4), region = 73 }
 0x12f   :  { %687 = vsyncpa [#allocation3], 1 }
 0x130   :  { %689 = vsyncpa [#allocation3 + $0x1], 1 }

</bundles_post_ra>
